<compile_context>
chip_gen: v7x
topology: tpu7x:2x2x1
jax: 0.10.0
libtpu: 0.0.40
codegen_flags: <defaults>
</compile_context>

<pallas_src>
import functools

import jax
import jax.numpy as jnp
from jax import lax
from jax.experimental import pallas as pl
from jax.experimental.pallas import tpu as pltpu


def _smooth_ap_row_kernel(q_ref, pt_ref, lab_col_ref, lab_row_ref, terms_ref, *,
                          half_inv_anneal, tm):
    q = q_ref[...]            # (TM, D) f32 : this step's query rows
    pt = pt_ref[...]          # (D,  N) f32 : resident transposed gallery

    # (TM, N) similarity tile on the MXU (lane-dense N, no RHS relayout).
    sim = jnp.dot(q, pt, preferred_element_type=jnp.float32)

    # Anchor column straight from the MXU result so sg[:, 0] == 0.5 exactly,
    # matching the reference (no accumulation-order mismatch that the sharp
    # 1/anneal temperature would amplify).
    anchor = sim[:, 0:1]                                            # (TM, 1)

    # Temperature sigmoid with a single EUP transcendental:
    #   sigmoid(x) = 0.5 * tanh(x / 2) + 0.5
    # The torch +/-50 clamp is numerically invisible in f32 and dropped.
    sg = 0.5 * jnp.tanh((sim - anchor) * half_inv_anneal) + 0.5     # (TM, N)

    # Direct masked sums, exactly the reference's I_pos / I_neg reductions:
    # I_pos = same label excluding self (iota diagonal mask), I_neg = different
    # label.  No matched/total cancellation, no separate diag_sg term.
    matches = lab_col_ref[...] == lab_row_ref[...]                  # (TM, N)
    row_ids = pl.program_id(0) * tm + lax.broadcasted_iota(jnp.int32, sg.shape, 0)
    col_ids = lax.broadcasted_iota(jnp.int32, sg.shape, 1)
    i_pos = matches & (row_ids != col_ids)

    sim_pos = jnp.sum(jnp.where(i_pos, sg, 0.0), axis=-1, keepdims=True)  # (TM,1)
    sim_neg = jnp.sum(jnp.where(matches, 0.0, sg), axis=-1, keepdims=True)

    terms_ref[...] = (1.0 + sim_pos) / (1.0 + sim_pos + sim_neg)


def _vmem_limit_bytes():
    """Generation-aware scoped-VMEM limit (~80% of physical, capped)."""
    try:
        cap = int(pltpu.get_tpu_info().vmem_capacity_bytes)
    except Exception:
        cap = 64 * 1024 * 1024  # conservative fallback (v7x physical per-TC size)
    return min(int(cap * 0.8), 112 * 1024 * 1024)


def _pick_row_tile(n, d, vmem_limit):
    """Largest row tile whose live set fits in ~70% of the VMEM budget.

    Live set per step: resident (D,N) gallery + label row (single-buffered),
    double-buffered (TM,D) query tile, ~4 live (TM,N) f32 temporaries
    (sim / sg / masked selects) and the tiny (TM,1) output.  v7x's smaller
    VMEM therefore caps TM automatically; v5e/v6e keep larger tiles.
    """
    budget = 0.7 * vmem_limit
    resident = 4 * (n * d + n)
    for tm in (256, 128, 64, 32, 16, 8):
        if n % tm:
            continue
        live = resident + 2 * 4 * tm * d + 4 * 4 * tm * n + 2 * 4 * tm
        if live <= budget:
            return tm
    # Small / ragged N fallback: a single full-size tile is always a legal block.
    return 8 if n % 8 == 0 else n


def _resident_spec(block_shape, single_buffer):
    """Constant-index_map (resident) input spec; single-buffered when supported."""
    index_map = lambda i: (0, 0)
    if single_buffer:
        return pl.BlockSpec(block_shape, index_map, pipeline_mode=pl.Buffered(1))
    return pl.BlockSpec(block_shape, index_map)


def _run_terms(preds, preds_t, lab_col, lab_row, *, tm, inv_anneal, vmem_limit,
               single_buffer_resident):
    n, d = preds.shape
    cost = pl.CostEstimate(
        flops=2 * n * n * d,
        transcendentals=n * n,                        # one tanh per sim entry
        bytes_accessed=2 * n * d * 4 + 2 * n * 4 + n * 4,
    )
    kernel = functools.partial(
        _smooth_ap_row_kernel, half_inv_anneal=0.5 * inv_anneal, tm=tm)
    return pl.pallas_call(
        kernel,
        out_shape=jax.ShapeDtypeStruct((n, 1), jnp.float32),
        grid=(n // tm,),
        in_specs=[
            pl.BlockSpec((tm, d), lambda i: (i, 0)),               # query row tile
            _resident_spec((d, n), single_buffer_resident),        # gallery^T, resident
            pl.BlockSpec((tm, 1), lambda i: (i, 0)),               # labels, this row tile
            _resident_spec((1, n), single_buffer_resident),        # all labels, resident
        ],
        out_specs=pl.BlockSpec((tm, 1), lambda i: (i, 0)),
        compiler_params=pltpu.CompilerParams(
            dimension_semantics=("parallel",),   # independent row tiles -> megacore (v7x)
            vmem_limit_bytes=vmem_limit,
        ),
        cost_estimate=cost,
    )(preds, preds_t, lab_col, lab_row)


def smooth_ap_loss(preds, labels, anneal=0.01):
    """Pallas SmoothAP forward. preds: (N, D) float, labels: (N,) int."""
    preds = preds.astype(jnp.float32)
    n, d = preds.shape
    preds_t = preds.T                               # one-time transpose in the wrapper
    lab_col = labels.reshape(n, 1).astype(jnp.int32)
    lab_row = labels.reshape(1, n).astype(jnp.int32)

    vmem_limit = _vmem_limit_bytes()
    tm = _pick_row_tile(n, d, vmem_limit)
    inv_anneal = 1.0 / float(anneal)

    try:
        terms = _run_terms(preds, preds_t, lab_col, lab_row, tm=tm,
                           inv_anneal=inv_anneal, vmem_limit=vmem_limit,
                           single_buffer_resident=True)
    except Exception:
        # pl.Buffered(1) on resident inputs is a pure VMEM-headroom optimization;
        # fall back to default (double-buffered) specs if this JAX build rejects it.
        terms = _run_terms(preds, preds_t, lab_col, lab_row, tm=tm,
                           inv_anneal=inv_anneal, vmem_limit=vmem_limit,
                           single_buffer_resident=False)

    # Tiny O(N) epilogue: average per-row terms and form the loss.
    return 1.0 - jnp.sum(terms[:, 0]) / jnp.float32(n)


def smooth_ap_loss_ref(preds, labels, anneal=0.01):
    """Pure-JAX reference, mirrors the PyTorch module exactly."""
    preds = preds.astype(jnp.float32)
    n = labels.shape[0]
    matches = labels[:, None] == labels[None, :]
    eye = jnp.eye(n, dtype=bool)
    i_pos = (matches & ~eye).astype(jnp.float32)
    i_neg = (~matches).astype(jnp.float32)
    sim = preds @ preds.T
    sim_diff = sim - sim[:, 0:1]
    x = sim_diff / anneal
    x = jnp.where(x > 50.0, 50.0, x)
    x = jnp.where(x < -50.0, -50.0, x)
    sg = jax.nn.sigmoid(x)
    sim_neg = jnp.sum(sg * i_neg, axis=-1)
    sim_pos = jnp.sum(sg * i_pos, axis=-1)
    ap = jnp.sum((1.0 + sim_pos) / (1.0 + sim_pos + sim_neg)) / n
    return 1.0 - ap


if __name__ == "__main__":
    key = jax.random.PRNGKey(0)
    N, D = 8, 32  # batch of 8 embeddings, feature dim 32
    preds = jax.random.normal(key, (N, D), dtype=jnp.float32)
    preds = preds / jnp.linalg.norm(preds, axis=-1, keepdims=True)
    labels = jnp.array([0, 0, 1, 1, 2, 2, 3, 3], dtype=jnp.int32)

    loss = smooth_ap_loss(preds, labels, anneal=0.01)
    loss = jax.block_until_ready(loss)

    ref = smooth_ap_loss_ref(preds, labels, anneal=0.01)
    assert jnp.allclose(loss, ref, rtol=1e-5, atol=1e-5), (loss, ref)

    print("KERNEL_OK")
</pallas_src>

<mosaic_0001>
module attributes {stable_mosaic.version = 11 : i64} {
  func.func @_smooth_ap_row_kernel(%arg0: i32, %arg1: memref<8x32xf32, #tpu.memory_space<vmem>>, %arg2: memref<32x8xf32, #tpu.memory_space<vmem>>, %arg3: memref<8x1xi32, #tpu.memory_space<vmem>>, %arg4: memref<1x8xi32, #tpu.memory_space<vmem>>, %arg5: memref<8x1xf32, #tpu.memory_space<vmem>>) attributes {dimension_semantics = [#tpu.dimension_semantics<parallel>], iteration_bounds = array<i64: 1>, scalar_prefetch = 0 : i64, scratch_operands = 0 : i64, tpu.core_type = #tpu.core_type<tc>, window_params = [{transform_indices = @transform_0, window_bounds = array<i64: 8, 32>}, {pipeline_mode = #tpu.pipeline_mode<synchronous>, transform_indices = @transform_1, window_bounds = array<i64: 32, 8>}, {transform_indices = @transform_2, window_bounds = array<i64: 8, 1>}, {pipeline_mode = #tpu.pipeline_mode<synchronous>, transform_indices = @transform_3, window_bounds = array<i64: 1, 8>}, {transform_indices = @transform_4, window_bounds = array<i64: 8, 1>}]} {
    %c0 = arith.constant 0 : index
    %c0_0 = arith.constant 0 : index
    %0 = vector.load %arg1[%c0, %c0_0] : memref<8x32xf32, #tpu.memory_space<vmem>>, vector<8x32xf32>
    %c0_1 = arith.constant 0 : index
    %c0_2 = arith.constant 0 : index
    %1 = vector.load %arg2[%c0_1, %c0_2] : memref<32x8xf32, #tpu.memory_space<vmem>>, vector<32x8xf32>
    %cst = arith.constant dense<0.000000e+00> : vector<8x8xf32>
    %2 = tpu.matmul %0, %1, %cst {dimension_numbers = #tpu.dot_dimension_numbers<[1], [0], [0], [1], [0, 0, 1, 1], [], []>} : vector<8x32xf32>, vector<32x8xf32>, vector<8x8xf32> -> vector<8x8xf32>
    %3 = vector.extract_strided_slice %2 {offsets = [0, 0], sizes = [8, 1], strides = [1, 1]} : vector<8x8xf32> to vector<8x1xf32>
    %4 = vector.broadcast %3 : vector<8x1xf32> to vector<8x8xf32>
    %5 = arith.subf %2, %4 : vector<8x8xf32>
    %cst_3 = arith.constant 5.000000e+01 : f32
    %6 = vector.broadcast %cst_3 : f32 to vector<8x8xf32>
    %7 = arith.mulf %5, %6 : vector<8x8xf32>
    %8 = math.tanh %7 : vector<8x8xf32>
    %cst_4 = arith.constant 5.000000e-01 : f32
    %9 = vector.broadcast %cst_4 : f32 to vector<8x8xf32>
    %10 = arith.mulf %9, %8 : vector<8x8xf32>
    %cst_5 = arith.constant 5.000000e-01 : f32
    %11 = vector.broadcast %cst_5 : f32 to vector<8x8xf32>
    %12 = arith.addf %10, %11 : vector<8x8xf32>
    %c0_6 = arith.constant 0 : index
    %c0_7 = arith.constant 0 : index
    %13 = vector.load %arg3[%c0_6, %c0_7] : memref<8x1xi32, #tpu.memory_space<vmem>>, vector<8x1xi32>
    %c0_8 = arith.constant 0 : index
    %c0_9 = arith.constant 0 : index
    %14 = vector.load %arg4[%c0_8, %c0_9] : memref<1x8xi32, #tpu.memory_space<vmem>>, vector<1x8xi32>
    %15 = vector.broadcast %13 : vector<8x1xi32> to vector<8x8xi32>
    %16 = vector.broadcast %14 : vector<1x8xi32> to vector<8x8xi32>
    %17 = arith.cmpi eq, %15, %16 : vector<8x8xi32>
    %c8_i32 = arith.constant 8 : i32
    %18 = arith.muli %arg0, %c8_i32 : i32
    %19 = tpu.iota {dimensions = array<i32: 0>} : vector<8x8xi32>
    %20 = vector.broadcast %18 : i32 to vector<8x8xi32>
    %21 = arith.addi %20, %19 : vector<8x8xi32>
    %22 = tpu.iota {dimensions = array<i32: 1>} : vector<8x8xi32>
    %23 = arith.cmpi ne, %21, %22 : vector<8x8xi32>
    %24 = arith.andi %17, %23 : vector<8x8xi1>
    %cst_10 = arith.constant 0.000000e+00 : f32
    %25 = vector.broadcast %cst_10 : f32 to vector<8x8xf32>
    %26 = arith.select %24, %12, %25 : vector<8x8xi1>, vector<8x8xf32>
    %cst_11 = arith.constant dense<0.000000e+00> : vector<8xf32>
    %27 = vector.multi_reduction <add>, %26, %cst_11 [1] : vector<8x8xf32> to vector<8xf32>
    %28 = vector.shape_cast %27 : vector<8xf32> to vector<8x1xf32>
    %cst_12 = arith.constant 0.000000e+00 : f32
    %29 = vector.broadcast %cst_12 : f32 to vector<8x8xf32>
    %30 = arith.select %17, %29, %12 : vector<8x8xi1>, vector<8x8xf32>
    %cst_13 = arith.constant dense<0.000000e+00> : vector<8xf32>
    %31 = vector.multi_reduction <add>, %30, %cst_13 [1] : vector<8x8xf32> to vector<8xf32>
    %32 = vector.shape_cast %31 : vector<8xf32> to vector<8x1xf32>
    %cst_14 = arith.constant 1.000000e+00 : f32
    %33 = vector.broadcast %cst_14 : f32 to vector<8x1xf32>
    %34 = arith.addf %33, %28 : vector<8x1xf32>
    %cst_15 = arith.constant 1.000000e+00 : f32
    %35 = vector.broadcast %cst_15 : f32 to vector<8x1xf32>
    %36 = arith.addf %35, %28 : vector<8x1xf32>
    %37 = arith.addf %36, %32 : vector<8x1xf32>
    %38 = arith.divf %34, %37 : vector<8x1xf32>
    %c0_16 = arith.constant 0 : index
    %c0_17 = arith.constant 0 : index
    %39 = vector.load %arg5[%c0_16, %c0_17] : memref<8x1xf32, #tpu.memory_space<vmem>>, vector<8x1xf32>
    tpu.vector_store %arg5[%c0_16, %c0_17], %38 {strides = array<i32>} : memref<8x1xf32, #tpu.memory_space<vmem>>, vector<8x1xf32>,
    return
  }
  func.func @transform_0(%arg0: i32) -> (i32, i32) {
    %c0_i32 = arith.constant 0 : i32
    %c0_i32_0 = arith.constant 0 : i32
    return %arg0, %c0_i32 : i32, i32
  }
  func.func @transform_1(%arg0: i32) -> (i32, i32) {
    %c0_i32 = arith.constant 0 : i32
    %c0_i32_0 = arith.constant 0 : i32
    %c0_i32_1 = arith.constant 0 : i32
    return %c0_i32, %c0_i32_0 : i32, i32
  }
  func.func @transform_2(%arg0: i32) -> (i32, i32) {
    %c0_i32 = arith.constant 0 : i32
    %c0_i32_0 = arith.constant 0 : i32
    return %arg0, %c0_i32 : i32, i32
  }
  func.func @transform_3(%arg0: i32) -> (i32, i32) {
    %c0_i32 = arith.constant 0 : i32
    %c0_i32_0 = arith.constant 0 : i32
    %c0_i32_1 = arith.constant 0 : i32
    return %c0_i32, %c0_i32_0 : i32, i32
  }
  func.func @transform_4(%arg0: i32) -> (i32, i32) {
    %c0_i32 = arith.constant 0 : i32
    %c0_i32_0 = arith.constant 0 : i32
    return %arg0, %c0_i32 : i32, i32
  }
}

module attributes {stable_mosaic.version = 11 : i64} {
  func.func @_smooth_ap_row_kernel(%arg0: i32, %arg1: memref<8x32xf32, #tpu.memory_space<vmem>>, %arg2: memref<32x8xf32, #tpu.memory_space<vmem>>, %arg3: memref<8x1xi32, #tpu.memory_space<vmem>>, %arg4: memref<1x8xi32, #tpu.memory_space<vmem>>, %arg5: memref<8x1xf32, #tpu.memory_space<vmem>>) attributes {dimension_semantics = [#tpu.dimension_semantics<parallel>], iteration_bounds = array<i64: 1>, scalar_prefetch = 0 : i64, scratch_operands = 0 : i64, tpu.core_type = #tpu.core_type<tc>, window_params = [{transform_indices = @transform_0, window_bounds = array<i64: 8, 32>}, {pipeline_mode = #tpu.pipeline_mode<synchronous>, transform_indices = @transform_1, window_bounds = array<i64: 32, 8>}, {transform_indices = @transform_2, window_bounds = array<i64: 8, 1>}, {pipeline_mode = #tpu.pipeline_mode<synchronous>, transform_indices = @transform_3, window_bounds = array<i64: 1, 8>}, {transform_indices = @transform_4, window_bounds = array<i64: 8, 1>}]} {
    %c0 = arith.constant 0 : index
    %c0_0 = arith.constant 0 : index
    %0 = vector.load %arg1[%c0, %c0_0] : memref<8x32xf32, #tpu.memory_space<vmem>>, vector<8x32xf32>
    %c0_1 = arith.constant 0 : index
    %c0_2 = arith.constant 0 : index
    %1 = vector.load %arg2[%c0_1, %c0_2] : memref<32x8xf32, #tpu.memory_space<vmem>>, vector<32x8xf32>
    %cst = arith.constant dense<0.000000e+00> : vector<8x8xf32>
    %2 = tpu.matmul %0, %1, %cst {dimension_numbers = #tpu.dot_dimension_numbers<[1], [0], [0], [1], [0, 0, 1, 1], [], []>} : vector<8x32xf32>, vector<32x8xf32>, vector<8x8xf32> -> vector<8x8xf32>
    %3 = vector.extract_strided_slice %2 {offsets = [0, 0], sizes = [8, 1], strides = [1, 1]} : vector<8x8xf32> to vector<8x1xf32>
    %4 = vector.broadcast %3 : vector<8x1xf32> to vector<8x8xf32>
    %5 = arith.subf %2, %4 : vector<8x8xf32>
    %cst_3 = arith.constant 5.000000e+01 : f32
    %6 = vector.broadcast %cst_3 : f32 to vector<8x8xf32>
    %7 = arith.mulf %5, %6 : vector<8x8xf32>
    %8 = math.tanh %7 : vector<8x8xf32>
    %cst_4 = arith.constant 5.000000e-01 : f32
    %9 = vector.broadcast %cst_4 : f32 to vector<8x8xf32>
    %10 = arith.mulf %9, %8 : vector<8x8xf32>
    %cst_5 = arith.constant 5.000000e-01 : f32
    %11 = vector.broadcast %cst_5 : f32 to vector<8x8xf32>
    %12 = arith.addf %10, %11 : vector<8x8xf32>
    %c0_6 = arith.constant 0 : index
    %c0_7 = arith.constant 0 : index
    %13 = vector.load %arg3[%c0_6, %c0_7] : memref<8x1xi32, #tpu.memory_space<vmem>>, vector<8x1xi32>
    %c0_8 = arith.constant 0 : index
    %c0_9 = arith.constant 0 : index
    %14 = vector.load %arg4[%c0_8, %c0_9] : memref<1x8xi32, #tpu.memory_space<vmem>>, vector<1x8xi32>
    %15 = vector.broadcast %13 : vector<8x1xi32> to vector<8x8xi32>
    %16 = vector.broadcast %14 : vector<1x8xi32> to vector<8x8xi32>
    %17 = arith.cmpi eq, %15, %16 : vector<8x8xi32>
    %c8_i32 = arith.constant 8 : i32
    %18 = arith.muli %arg0, %c8_i32 : i32
    %19 = tpu.iota {dimensions = array<i32: 0>} : vector<8x8xi32>
    %20 = vector.broadcast %18 : i32 to vector<8x8xi32>
    %21 = arith.addi %20, %19 : vector<8x8xi32>
    %22 = tpu.iota {dimensions = array<i32: 1>} : vector<8x8xi32>
    %23 = arith.cmpi ne, %21, %22 : vector<8x8xi32>
    %24 = arith.andi %17, %23 : vector<8x8xi1>
    %cst_10 = arith.constant 0.000000e+00 : f32
    %25 = vector.broadcast %cst_10 : f32 to vector<8x8xf32>
    %26 = arith.select %24, %12, %25 : vector<8x8xi1>, vector<8x8xf32>
    %cst_11 = arith.constant dense<0.000000e+00> : vector<8xf32>
    %27 = vector.multi_reduction <add>, %26, %cst_11 [1] : vector<8x8xf32> to vector<8xf32>
    %28 = vector.shape_cast %27 : vector<8xf32> to vector<8x1xf32>
    %cst_12 = arith.constant 0.000000e+00 : f32
    %29 = vector.broadcast %cst_12 : f32 to vector<8x8xf32>
    %30 = arith.select %17, %29, %12 : vector<8x8xi1>, vector<8x8xf32>
    %cst_13 = arith.constant dense<0.000000e+00> : vector<8xf32>
    %31 = vector.multi_reduction <add>, %30, %cst_13 [1] : vector<8x8xf32> to vector<8xf32>
    %32 = vector.shape_cast %31 : vector<8xf32> to vector<8x1xf32>
    %cst_14 = arith.constant 1.000000e+00 : f32
    %33 = vector.broadcast %cst_14 : f32 to vector<8x1xf32>
    %34 = arith.addf %33, %28 : vector<8x1xf32>
    %cst_15 = arith.constant 1.000000e+00 : f32
    %35 = vector.broadcast %cst_15 : f32 to vector<8x1xf32>
    %36 = arith.addf %35, %28 : vector<8x1xf32>
    %37 = arith.addf %36, %32 : vector<8x1xf32>
    %38 = arith.divf %34, %37 : vector<8x1xf32>
    %c0_16 = arith.constant 0 : index
    %c0_17 = arith.constant 0 : index
    %39 = vector.load %arg5[%c0_16, %c0_17] : memref<8x1xf32, #tpu.memory_space<vmem>>, vector<8x1xf32>
    tpu.vector_store %arg5[%c0_16, %c0_17], %38 {strides = array<i32>} : memref<8x1xf32, #tpu.memory_space<vmem>>, vector<8x1xf32>,
    return
  }
  func.func @transform_0(%arg0: i32) -> (i32, i32) {
    %c0_i32 = arith.constant 0 : i32
    %c0_i32_0 = arith.constant 0 : i32
    return %arg0, %c0_i32 : i32, i32
  }
  func.func @transform_1(%arg0: i32) -> (i32, i32) {
    %c0_i32 = arith.constant 0 : i32
    %c0_i32_0 = arith.constant 0 : i32
    %c0_i32_1 = arith.constant 0 : i32
    return %c0_i32, %c0_i32_0 : i32, i32
  }
  func.func @transform_2(%arg0: i32) -> (i32, i32) {
    %c0_i32 = arith.constant 0 : i32
    %c0_i32_0 = arith.constant 0 : i32
    return %arg0, %c0_i32 : i32, i32
  }
  func.func @transform_3(%arg0: i32) -> (i32, i32) {
    %c0_i32 = arith.constant 0 : i32
    %c0_i32_0 = arith.constant 0 : i32
    %c0_i32_1 = arith.constant 0 : i32
    return %c0_i32, %c0_i32_0 : i32, i32
  }
  func.func @transform_4(%arg0: i32) -> (i32, i32) {
    %c0_i32 = arith.constant 0 : i32
    %c0_i32_0 = arith.constant 0 : i32
    return %arg0, %c0_i32 : i32, i32
  }
}

</mosaic_0001>

<bundles_post_ra>
// kernel: tpu_custom_call.1
= control target key start
LH: loop header
LB: loop body
LE: loop exit
PB: predicated region body
PF: predicated region fallthrough
CT: control target
= control target key end

     0   :  { %v177_v0 = vmov 0.0|0.0   ;;  %vm178_vm0 = vmmov 0   ;;  %v179_v4 = vmov 0.0   ;;  %v180_v7 = vmov 0   ;;  %s230_s1 = inlined_call_operand.vmem [shape: f32[32,8], index: 1, kind: input, shape index: {}]   ;;  %s231_s0 = inlined_call_operand.vmem [shape: f32[8,32], index: 0, kind: input, shape index: {}]   ;;  %s232_s2 = inlined_call_operand.vmem [shape: s32[8,1], index: 2, kind: input, shape index: {}]   ;;  %s233_s3 = inlined_call_operand.vmem [shape: s32[1,8], index: 3, kind: input, shape index: {}]   ;;  %s234_s4 = inlined_call_operand.vmem [shape: f32[8,1], index: 4, kind: output, shape index: {}]  }
   0x1   :  { %162 = vmatprep.subr.bf16.mxu0 %v177_v0  ;;  %v18_v1 = vld [vmem:[%s230_s1] sm:$0xff]  ;;  %v19_v2 = vld [vmem:[%s230_s1 + $0x8] sm:$0xff]  ;;  %v20_v3 = vld [vmem:[%s230_s1 + $0x10] sm:$0xff]  ;;  %159 = vmatprep.mubr.msk.f32.mxu0 %vm178_vm0, %v179_v4  ;;  %vm22_vm1 = vcmask 261120   ;;  %v117_v16 = vlaneseq  ;;  %vm126_vm4 = vcmask 64512   ;;  %vm138_vm6 = vcmask 7168  }
   0x2   :  { %v163_v5 = vpack.c.bf16 %v19_v2, %v18_v1  ;;  %v21_v6 = vld [vmem:[%s230_s1 + $0x18] sm:$0xff]  ;;  %172 = vset.pattern.permute.xlu0 %v180_v7  ;;  %v17_v9 = vld [vmem:[%s231_s0] sm:$0xff] }
   0x3   :  { %v166_v8 = vpack.c.bf16 %v21_v6, %v20_v3  ;;  %v106_v12 = vld [vmem:[%s232_s2] sm:$0xff]  ;;  %v118_v17 = vshrl.u32 %v117_v16, 7  ;;  %v122_v18 = vand.u32 127, %v117_v16 }
   0x4   :  { %164 = vmatpush3.bf16.msra.mxu0 %v163_v5  ;;  %v145_v19 = vld [vmem:[%s233_s3] ss:$0 sm:$0xff] }
   0x5   :  { %165 = vmatprep.subr.bf16.mxu0 %v177_v0  ;;  %vm123_vm2 = vcmp.ne.s32.totalorder %v118_v17, %v122_v18 }
   0x8   :  { %167 = vmatpush3.bf16.msra.mxu0 %v166_v8 }
   0xb   :  { %160 = vmatmul.mubr.msk.f32.vlgmr.msra.gmra.mrb[0].mxu0 %vm22_vm1, %v17_v9 }
  0xde   :  { %v92_v10 = vpop.f32.mrb[0].mxu0 }
  0xdf   :  { %98 = vperm.xlu0 %172, %v92_v10   ;;  %v161_v11 = vpop.f32.mrb[1].mxu0 }
  0xe3   :  { %109 = vperm.xlu0 %172, %v106_v12  }
 0x15e   :  { %v99_v13 = vpop.permute.xlu0 %98 }
 0x15f   :  { %v101_v14 = vsub.f32 %v92_v10, %v99_v13 }
 0x161   :  { %v102_v15 = vmul.f32 50.0, %v101_v14 }
 0x162   :  { %v110_v20 = vpop.permute.xlu0 %109 }
 0x163   :  { %173 = vtanh.f32 %v102_v15  ;;  %vm115_vm3 = vcmp.eq.s32.totalorder %v110_v20, %v145_v19 }
 0x164   :  { %vm124_vm5 = vmand %vm115_vm3, %vm123_vm2 }
 0x16d   :  { %v174_v21 = vpop.eup %173 }
 0x16e   :  { %v104_v22 = vmul.f32 0.5, %v174_v21 }
 0x170   :  { %v105_v23 = vadd.f32 0.5, %v104_v22 }
 0x172   :  { %v125_v24 = vsel %vm124_vm5, %v105_v23, 0.0  ;;  %v130_v26 = vsel %vm115_vm3, 0.0, %v105_v23 }
 0x173   :  { %v127_v25 = vsel %vm126_vm4, %v125_v24, 0.0  ;;  %v131_v27 = vsel %vm126_vm4, %v130_v26, 0.0 }
 0x174   :  { %128 = vadd.xlane.f32.xlu1 %v127_v25 }
 0x178   :  { %132 = vadd.xlane.f32.xlu1 %v131_v27 }
 0x201   :  { %v129_v28 = vpop.xlane.xlu1 %128 }
 0x202   :  { %v134_v29 = vadd.f32 1.0, %v129_v28 }
 0x205   :  { %v133_v30 = vpop.xlane.xlu1 %132 }
 0x206   :  { %v135_v31 = vadd.f32 %v134_v29, %v133_v30 }
 0x208   :  { %175 = vrcp.f32 %v135_v31 }
 0x212   :  { %v176_v32 = vpop.eup %175 }
 0x213   :  { %v137_v33 = vmul.f32 %v176_v32, %v134_v29 }
 0x215   :  { %139 = vst.msk [vmem:[%s234_s4] sm:$0xff] %vm138_vm6, %v137_v33 }

// kernel: tpu_custom_call.1
= control target key start
LH: loop header
LB: loop body
LE: loop exit
PB: predicated region body
PF: predicated region fallthrough
CT: control target
= control target key end

     0   :  { %v177_v0 = vmov 0.0|0.0   ;;  %vm178_vm0 = vmmov 0   ;;  %v179_v4 = vmov 0.0   ;;  %v180_v7 = vmov 0   ;;  %s230_s1 = inlined_call_operand.vmem [shape: f32[32,8], index: 1, kind: input, shape index: {}]   ;;  %s231_s0 = inlined_call_operand.vmem [shape: f32[8,32], index: 0, kind: input, shape index: {}]   ;;  %s232_s2 = inlined_call_operand.vmem [shape: s32[8,1], index: 2, kind: input, shape index: {}]   ;;  %s233_s3 = inlined_call_operand.vmem [shape: s32[1,8], index: 3, kind: input, shape index: {}]   ;;  %s234_s4 = inlined_call_operand.vmem [shape: f32[8,1], index: 4, kind: output, shape index: {}]  }
   0x1   :  { %162 = vmatprep.subr.bf16.mxu0 %v177_v0  ;;  %v18_v1 = vld [vmem:[%s230_s1] sm:$0xff]  ;;  %v19_v2 = vld [vmem:[%s230_s1 + $0x8] sm:$0xff]  ;;  %v20_v3 = vld [vmem:[%s230_s1 + $0x10] sm:$0xff]  ;;  %159 = vmatprep.mubr.msk.f32.mxu0 %vm178_vm0, %v179_v4  ;;  %vm22_vm1 = vcmask 261120   ;;  %v117_v16 = vlaneseq  ;;  %vm126_vm4 = vcmask 64512   ;;  %vm138_vm6 = vcmask 7168  }
   0x2   :  { %v163_v5 = vpack.c.bf16 %v19_v2, %v18_v1  ;;  %v21_v6 = vld [vmem:[%s230_s1 + $0x18] sm:$0xff]  ;;  %172 = vset.pattern.permute.xlu0 %v180_v7  ;;  %v17_v9 = vld [vmem:[%s231_s0] sm:$0xff] }
   0x3   :  { %v166_v8 = vpack.c.bf16 %v21_v6, %v20_v3  ;;  %v106_v12 = vld [vmem:[%s232_s2] sm:$0xff]  ;;  %v118_v17 = vshrl.u32 %v117_v16, 7  ;;  %v122_v18 = vand.u32 127, %v117_v16 }
   0x4   :  { %164 = vmatpush3.bf16.msra.mxu0 %v163_v5  ;;  %v145_v19 = vld [vmem:[%s233_s3] ss:$0 sm:$0xff] }
   0x5   :  { %165 = vmatprep.subr.bf16.mxu0 %v177_v0  ;;  %vm123_vm2 = vcmp.ne.s32.totalorder %v118_v17, %v122_v18 }
   0x8   :  { %167 = vmatpush3.bf16.msra.mxu0 %v166_v8 }
   0xb   :  { %160 = vmatmul.mubr.msk.f32.vlgmr.msra.gmra.mrb[0].mxu0 %vm22_vm1, %v17_v9 }
  0xde   :  { %v92_v10 = vpop.f32.mrb[0].mxu0 }
  0xdf   :  { %98 = vperm.xlu0 %172, %v92_v10   ;;  %v161_v11 = vpop.f32.mrb[1].mxu0 }
  0xe3   :  { %109 = vperm.xlu0 %172, %v106_v12  }
 0x15e   :  { %v99_v13 = vpop.permute.xlu0 %98 }
 0x15f   :  { %v101_v14 = vsub.f32 %v92_v10, %v99_v13 }
 0x161   :  { %v102_v15 = vmul.f32 50.0, %v101_v14 }
 0x162   :  { %v110_v20 = vpop.permute.xlu0 %109 }
 0x163   :  { %173 = vtanh.f32 %v102_v15  ;;  %vm115_vm3 = vcmp.eq.s32.totalorder %v110_v20, %v145_v19 }
 0x164   :  { %vm124_vm5 = vmand %vm115_vm3, %vm123_vm2 }
 0x16d   :  { %v174_v21 = vpop.eup %173 }
 0x16e   :  { %v104_v22 = vmul.f32 0.5, %v174_v21 }
 0x170   :  { %v105_v23 = vadd.f32 0.5, %v104_v22 }
 0x172   :  { %v125_v24 = vsel %vm124_vm5, %v105_v23, 0.0  ;;  %v130_v26 = vsel %vm115_vm3, 0.0, %v105_v23 }
 0x173   :  { %v127_v25 = vsel %vm126_vm4, %v125_v24, 0.0  ;;  %v131_v27 = vsel %vm126_vm4, %v130_v26, 0.0 }
 0x174   :  { %128 = vadd.xlane.f32.xlu1 %v127_v25 }
 0x178   :  { %132 = vadd.xlane.f32.xlu1 %v131_v27 }
 0x201   :  { %v129_v28 = vpop.xlane.xlu1 %128 }
 0x202   :  { %v134_v29 = vadd.f32 1.0, %v129_v28 }
 0x205   :  { %v133_v30 = vpop.xlane.xlu1 %132 }
 0x206   :  { %v135_v31 = vadd.f32 %v134_v29, %v133_v30 }
 0x208   :  { %175 = vrcp.f32 %v135_v31 }
 0x212   :  { %v176_v32 = vpop.eup %175 }
 0x213   :  { %v137_v33 = vmul.f32 %v176_v32, %v134_v29 }
 0x215   :  { %139 = vst.msk [vmem:[%s234_s4] sm:$0xff] %vm138_vm6, %v137_v33 }

</bundles_post_ra>
